<compile_context>
chip_gen: v7x
topology: tpu7x:2x2x1
jax: 0.10.0
libtpu: 0.0.40
codegen_flags: <defaults>
</compile_context>

<pallas_src>
import jax
import jax.numpy as jnp
from jax.experimental import pallas as pl
from jax.experimental.pallas import tpu as pltpu

IGNORE_INDEX = 255
SMOOTH_FACTOR = 0.05   # SoftCrossEntropyLoss(smooth_factor=0.05)
DICE_SMOOTH = 0.05     # DiceLoss(smooth=0.05)
DICE_EPS = 1e-7


# ----------------------------- Pallas kernel --------------------------------
def _make_kernel(n_heads, C, TN, HW, needs_tail):
    """Grid (B, S, T). Per tile (C, TN):
      - head 0 (main): Dice per-class partial sums (intersection / pred-mass /
        target-mass) accumulated into a lane-dense (C, 128) slab (lanes 0..2).
      - every head: SoftCE scalar partial sums (nll, smooth) accumulated into
        an (8, 128) slab, row = head, lane 0 = nll, lane 1 = smooth.
    Output blocks are resident across the t axis (same block index), so we
    zero them at t == 0 and accumulate in place."""

    def kernel(*refs):
        labels_ref = refs[0]
        logits_refs = refs[1:1 + n_heads]
        dice_ref = refs[1 + n_heads]     # (1, C, 128)
        ce_ref = refs[2 + n_heads]       # (1, 8, 128)

        t = pl.program_id(2)

        @pl.when(t == 0)
        def _():
            dice_ref[...] = jnp.zeros_like(dice_ref)
            ce_ref[...] = jnp.zeros_like(ce_ref)

        lbl = labels_ref[0]                               # (1, TN) int32
        valid = lbl != IGNORE_INDEX
        if needs_tail:
            pix = t * TN + jax.lax.broadcasted_iota(jnp.int32, (1, TN), 1)
            in_range = pix < HW
            valid = jnp.logical_and(valid, in_range)
        vmask = valid.astype(jnp.float32)                 # (1, TN)
        lbl_c = jnp.where(valid, lbl, 0)
        cls = jax.lax.broadcasted_iota(jnp.int32, (C, TN), 0)
        onehot_m = jnp.where(cls == lbl_c, vmask, 0.0)    # onehot * valid, (C, TN)

        nll_s = []
        smooth_s = []
        dice_tile = None
        for li in range(n_heads):
            x = logits_refs[li][0].astype(jnp.float32)    # (C, TN)
            if needs_tail:
                x = jnp.where(in_range, x, 0.0)           # keep tail garbage finite
            m = jnp.max(x, axis=0, keepdims=True)         # (1, TN)
            e = jnp.exp(x - m)                            # single exp per element
            ssum = jnp.sum(e, axis=0, keepdims=True)      # (1, TN)
            lse = m + jnp.log(ssum)                       # (1, TN) logsumexp
            xlab = jnp.sum(x * onehot_m, axis=0, keepdims=True)   # (1, TN) x[label]
            sumx = jnp.sum(x, axis=0, keepdims=True)               # (1, TN)

            # per-pixel SoftCE partials, reduced to per-tile scalars
            nll_s.append(jnp.sum(vmask * lse - xlab))
            smooth_s.append(jnp.sum(vmask * (float(C) * lse - sumx)))

            if li == 0:   # only the main head feeds the Dice loss
                prob = e * pl.reciprocal(ssum, approx=False)           # (C, TN)
                inter_c = jnp.sum(prob * onehot_m, axis=1, keepdims=True)  # (C,1)
                pred_c = jnp.sum(prob * vmask, axis=1, keepdims=True)      # (C,1)
                targ_c = jnp.sum(onehot_m, axis=1, keepdims=True)          # (C,1)
                col = jax.lax.broadcasted_iota(jnp.int32, (C, 128), 1)
                dice_tile = (jnp.where(col == 0, inter_c, 0.0)
                             + jnp.where(col == 1, pred_c, 0.0)
                             + jnp.where(col == 2, targ_c, 0.0))

        dice_ref[0] += dice_tile

        row = jax.lax.broadcasted_iota(jnp.int32, (8, 128), 0)
        col8 = jax.lax.broadcasted_iota(jnp.int32, (8, 128), 1)
        ce_tile = jnp.zeros((8, 128), jnp.float32)
        for li in range(n_heads):
            ce_tile = ce_tile + jnp.where(
                jnp.logical_and(row == li, col8 == 0), nll_s[li], 0.0)
            ce_tile = ce_tile + jnp.where(
                jnp.logical_and(row == li, col8 == 1), smooth_s[li], 0.0)
        ce_ref[0] += ce_tile

    return kernel


# ----------------------------- kernel launcher --------------------------------
def _loss_sums(logits_list, labels):
    """Run the fused accumulation kernel.

    Returns (dice_sums (C,128), ce_sums (8,128), total_pixel_count)."""
    B, C, H, W = logits_list[0].shape
    HW = H * W
    n_heads = len(logits_list)
    c_pad = ((C + 7) // 8) * 8
    itemsize = jnp.dtype(logits_list[0].dtype).itemsize

    # Device-derived VMEM budget (64 MiB on v7x, 128 MiB on v5e/v6e).
    try:
        vmem_cap = int(pltpu.get_tpu_info().vmem_capacity_bytes)
    except Exception:
        vmem_cap = 64 * 1024 * 1024
    budget = int(vmem_cap * 0.35)

    # Approximate VMEM bytes per pixel-lane: double-buffered labels + logits
    # inputs, plus ~6 live (C, TN) f32 temporaries in the kernel body.
    bytes_per_col = 64 + n_heads * 2 * c_pad * itemsize + 6 * c_pad * 4
    cap_cols = max(128, min(32768, (budget // bytes_per_col) // 128 * 128))

    # Pick TN: single full tile, or a divisor of HW (no ragged-tail masking),
    # or the masked-tail fallback for odd spatial sizes.
    if HW <= cap_cols:
        TN, num_tiles, needs_tail = HW, 1, False
    elif HW % 128 == 0:
        units = HW // 128
        d = cap_cols // 128
        while d > 1 and units % d != 0:
            d -= 1
        TN = 128 * d
        if TN * 2 < cap_cols:          # divisor too small -> prefer big ragged tiles
            TN, num_tiles, needs_tail = cap_cols, pl.cdiv(HW, cap_cols), True
        else:
            num_tiles, needs_tail = HW // TN, False
    else:
        TN, num_tiles, needs_tail = cap_cols, pl.cdiv(HW, cap_cols), True

    # Pixel-shard axis: second "parallel" axis so both v7x TensorCores work
    # even when B == 1 (harmless on single-TC v5e/v6e).
    if (not needs_tail) and num_tiles >= 2 and num_tiles % 2 == 0:
        S, TPS = 2, num_tiles // 2
    else:
        S, TPS = 1, num_tiles

    xs = [x.reshape(B, C, HW) for x in logits_list]         # free reshape (NCHW)
    lbl = labels.reshape(B, 1, HW).astype(jnp.int32)

    kernel = _make_kernel(n_heads, C, TN, HW, needs_tail)

    lbl_spec = pl.BlockSpec((1, 1, TN), lambda b, s, t: (b, 0, s * TPS + t))
    logit_spec = pl.BlockSpec((1, C, TN), lambda b, s, t: (b, 0, s * TPS + t))
    dice_spec = pl.BlockSpec((1, C, 128), lambda b, s, t: (b * S + s, 0, 0))
    ce_spec = pl.BlockSpec((1, 8, 128), lambda b, s, t: (b * S + s, 0, 0))

    vmem_limit = min(vmem_cap - (4 << 20),
                     max(32 << 20, 2 * bytes_per_col * TN + (8 << 20)))

    dice_out, ce_out = pl.pallas_call(
        kernel,
        out_shape=[jax.ShapeDtypeStruct((B * S, C, 128), jnp.float32),
                   jax.ShapeDtypeStruct((B * S, 8, 128), jnp.float32)],
        grid_spec=pltpu.PrefetchScalarGridSpec(
            num_scalar_prefetch=0,
            grid=(B, S, TPS),
            in_specs=[lbl_spec] + [logit_spec] * n_heads,
            out_specs=[dice_spec, ce_spec],
        ),
        compiler_params=pltpu.CompilerParams(
            dimension_semantics=("parallel", "parallel", "arbitrary"),
            vmem_limit_bytes=int(vmem_limit)),
    )(lbl, *xs)

    dice = jnp.sum(dice_out, axis=0)     # (C, 128)
    ce = jnp.sum(ce_out, axis=0)         # (8, 128)
    return dice, ce, B * HW


# ----------------------------- loss finalization -----------------------------
def _soft_ce_from_row(ce_row, n_total, num_classes):
    # label_smoothed_nll_loss, reduction="mean" over ALL pixels (ignored -> 0)
    nll_sum = ce_row[0]
    smooth_sum = ce_row[1]
    return ((1.0 - SMOOTH_FACTOR) * nll_sum
            + (SMOOTH_FACTOR / num_classes) * smooth_sum) / n_total


def _dice_from_slab(d):
    inter = d[:, 0]
    pred = d[:, 1]
    targ = d[:, 2]
    score = (2.0 * inter + DICE_SMOOTH) / jnp.maximum(pred + targ + DICE_SMOOTH,
                                                      DICE_EPS)
    loss_c = (1.0 - score) * (targ > 0).astype(jnp.float32)  # skip empty classes
    return jnp.mean(loss_c)


def unetformer_loss(logits, labels, training=False):
    """Matches UnetFormerLoss.forward.

    logits: (B, C, H, W) tensor, or (main, aux) tuple when training.
    labels: (B, H, W) int, 255 = ignore.
    """
    if training and isinstance(logits, (tuple, list)) and len(logits) == 2:
        heads = list(logits)
    else:
        heads = [logits]
    C = heads[0].shape[1]
    dice, ce, n = _loss_sums(heads, labels)                 # single fused kernel
    loss = _soft_ce_from_row(ce[0], n, C) + _dice_from_slab(dice)
    if len(heads) == 2:
        loss = loss + 0.4 * _soft_ce_from_row(ce[1], n, C)
    return loss


# ----------------------------- pure-JAX reference ----------------------------
def _ref_soft_ce(logits, labels):
    B, C, H, W = logits.shape
    logp = jax.nn.log_softmax(logits, axis=1)
    valid = labels != IGNORE_INDEX
    lblc = jnp.where(valid, labels, 0)
    nll = -jnp.take_along_axis(logp, lblc[:, None], axis=1)[:, 0]
    nll = jnp.where(valid, nll, 0.0)
    smooth = jnp.where(valid, -jnp.sum(logp, axis=1), 0.0)
    return (1.0 - SMOOTH_FACTOR) * nll.mean() + (SMOOTH_FACTOR / C) * smooth.mean()


def _ref_dice(logits, labels):
    B, C, H, W = logits.shape
    prob = jax.nn.softmax(logits, axis=1).reshape(B, C, -1)
    lbl = labels.reshape(B, -1)
    mask = (lbl != IGNORE_INDEX)
    prob = prob * mask[:, None, :]
    onehot = jax.nn.one_hot(jnp.where(mask, lbl, 0), C, axis=-1)        # (B, HW, C)
    onehot = jnp.transpose(onehot, (0, 2, 1)) * mask[:, None, :]        # (B, C, HW)
    dims = (0, 2)
    inter = jnp.sum(prob * onehot, axis=dims)
    card = jnp.sum(prob + onehot, axis=dims)
    score = (2.0 * inter + DICE_SMOOTH) / jnp.maximum(card + DICE_SMOOTH, DICE_EPS)
    loss = (1.0 - score) * (jnp.sum(onehot, axis=dims) > 0)
    return loss.mean()


def _ref_loss(logits, labels, training=False):
    if training and isinstance(logits, (tuple, list)) and len(logits) == 2:
        lm, la = logits
        return (_ref_soft_ce(lm, labels) + _ref_dice(lm, labels)
                + 0.4 * _ref_soft_ce(la, labels))
    return _ref_soft_ce(logits, labels) + _ref_dice(logits, labels)


# ----------------------------------- main ------------------------------------
if __name__ == "__main__":
    B, C, H, W = 2, 6, 16, 16
    key = jax.random.PRNGKey(0)
    k1, k2, k3, k4 = jax.random.split(key, 4)

    logit_main = jax.random.normal(k1, (B, C, H, W), jnp.float32)
    logit_aux = jax.random.normal(k2, (B, C, H, W), jnp.float32)
    labels = jax.random.randint(k3, (B, H, W), 0, C, jnp.int32)
    # sprinkle some ignore_index pixels
    ignore_mask = jax.random.uniform(k4, (B, H, W)) < 0.1
    labels = jnp.where(ignore_mask, IGNORE_INDEX, labels)

    # eval path (single logits tensor)
    loss_eval = jax.block_until_ready(
        unetformer_loss(logit_main, labels, training=False))
    # training path ((main, aux) tuple) — single fused kernel call
    loss_train = jax.block_until_ready(
        unetformer_loss((logit_main, logit_aux), labels, training=True))

    ref_eval = jax.block_until_ready(_ref_loss(logit_main, labels, training=False))
    ref_train = jax.block_until_ready(
        _ref_loss((logit_main, logit_aux), labels, training=True))

    assert jnp.allclose(loss_eval, ref_eval, rtol=1e-4, atol=1e-5), (loss_eval, ref_eval)
    assert jnp.allclose(loss_train, ref_train, rtol=1e-4, atol=1e-5), (loss_train, ref_train)

    print("KERNEL_OK")
</pallas_src>

<mosaic_0001>
module attributes {stable_mosaic.version = 11 : i64} {
  func.func @kernel(%arg0: i32, %arg1: i32, %arg2: i32, %arg3: memref<1x1x256xi32, #tpu.memory_space<vmem>>, %arg4: memref<1x6x256xf32, #tpu.memory_space<vmem>>, %arg5: memref<1x6x128xf32, #tpu.memory_space<vmem>>, %arg6: memref<1x8x128xf32, #tpu.memory_space<vmem>>) attributes {dimension_semantics = [#tpu.dimension_semantics<parallel>, #tpu.dimension_semantics<parallel>, #tpu.dimension_semantics<arbitrary>], iteration_bounds = array<i64: 2, 1, 1>, scalar_prefetch = 0 : i64, scratch_operands = 0 : i64, tpu.core_type = #tpu.core_type<tc>, window_params = [{transform_indices = @transform_0, window_bounds = array<i64: 1, 1, 256>}, {transform_indices = @transform_1, window_bounds = array<i64: 1, 6, 256>}, {transform_indices = @transform_2, window_bounds = array<i64: 1, 6, 128>}, {transform_indices = @transform_3, window_bounds = array<i64: 1, 8, 128>}]} {
    %c0_i32 = arith.constant 0 : i32
    %0 = arith.cmpi eq, %arg2, %c0_i32 : i32
    %1 = arith.extui %0 : i1 to i32
    %c0_i32_0 = arith.constant 0 : i32
    %2 = arith.cmpi ne, %1, %c0_i32_0 : i32
    scf.if %2 {
      %cst_40 = arith.constant 0.000000e+00 : f32
      %114 = vector.broadcast %cst_40 : f32 to vector<1x6x128xf32>
      %c0_41 = arith.constant 0 : index
      %c0_42 = arith.constant 0 : index
      %c0_43 = arith.constant 0 : index
      %115 = vector.load %arg5[%c0_41, %c0_42, %c0_43] : memref<1x6x128xf32, #tpu.memory_space<vmem>>, vector<1x6x128xf32>
      tpu.vector_store %arg5[%c0_41, %c0_42, %c0_43], %114 {strides = array<i32>} : memref<1x6x128xf32, #tpu.memory_space<vmem>>, vector<1x6x128xf32>,
      %cst_44 = arith.constant 0.000000e+00 : f32
      %116 = vector.broadcast %cst_44 : f32 to vector<1x8x128xf32>
      %c0_45 = arith.constant 0 : index
      %c0_46 = arith.constant 0 : index
      %c0_47 = arith.constant 0 : index
      %117 = vector.load %arg6[%c0_45, %c0_46, %c0_47] : memref<1x8x128xf32, #tpu.memory_space<vmem>>, vector<1x8x128xf32>
      tpu.vector_store %arg6[%c0_45, %c0_46, %c0_47], %116 {strides = array<i32>} : memref<1x8x128xf32, #tpu.memory_space<vmem>>, vector<1x8x128xf32>,
    } else {
    }
    %c0 = arith.constant 0 : index
    %c0_1 = arith.constant 0 : index
    %c0_2 = arith.constant 0 : index
    %3 = vector.load %arg3[%c0, %c0_1, %c0_2] : memref<1x1x256xi32, #tpu.memory_space<vmem>>, vector<1x1x256xi32>
    %4 = vector.shape_cast %3 : vector<1x1x256xi32> to vector<1x256xi32>
    %c255_i32 = arith.constant 255 : i32
    %5 = vector.broadcast %c255_i32 : i32 to vector<1x256xi32>
    %6 = arith.cmpi ne, %4, %5 : vector<1x256xi32>
    %7 = arith.extui %6 : vector<1x256xi1> to vector<1x256xi32>
    %8 = arith.sitofp %7 : vector<1x256xi32> to vector<1x256xf32>
    %c0_i32_3 = arith.constant 0 : i32
    %9 = vector.broadcast %c0_i32_3 : i32 to vector<1x256xi32>
    %10 = arith.select %6, %4, %9 : vector<1x256xi1>, vector<1x256xi32>
    %11 = tpu.iota {dimensions = array<i32: 0>} : vector<6x256xi32>
    %12 = vector.broadcast %10 : vector<1x256xi32> to vector<6x256xi32>
    %13 = arith.cmpi eq, %11, %12 : vector<6x256xi32>
    %cst = arith.constant 0.000000e+00 : f32
    %14 = vector.shape_cast %8 : vector<1x256xf32> to vector<1x256xf32>
    %15 = vector.broadcast %14 : vector<1x256xf32> to vector<6x256xf32>
    %16 = vector.broadcast %cst : f32 to vector<6x256xf32>
    %17 = arith.select %13, %15, %16 : vector<6x256xi1>, vector<6x256xf32>
    %c0_4 = arith.constant 0 : index
    %c0_5 = arith.constant 0 : index
    %c0_6 = arith.constant 0 : index
    %18 = vector.load %arg4[%c0_4, %c0_5, %c0_6] : memref<1x6x256xf32, #tpu.memory_space<vmem>>, vector<1x6x256xf32>
    %19 = vector.shape_cast %18 : vector<1x6x256xf32> to vector<6x256xf32>
    %cst_7 = arith.constant dense<0xFF800000> : vector<256xf32>
    %20 = vector.multi_reduction <maximumf>, %19, %cst_7 [0] : vector<6x256xf32> to vector<256xf32>
    %21 = vector.shape_cast %20 : vector<256xf32> to vector<1x256xf32>
    %22 = vector.broadcast %21 : vector<1x256xf32> to vector<6x256xf32>
    %23 = arith.subf %19, %22 : vector<6x256xf32>
    %24 = math.exp %23 : vector<6x256xf32>
    %cst_8 = arith.constant dense<0.000000e+00> : vector<256xf32>
    %25 = vector.multi_reduction <add>, %24, %cst_8 [0] : vector<6x256xf32> to vector<256xf32>
    %26 = vector.shape_cast %25 : vector<256xf32> to vector<1x256xf32>
    %27 = math.log %26 : vector<1x256xf32>
    %28 = arith.addf %21, %27 : vector<1x256xf32>
    %29 = arith.mulf %19, %17 : vector<6x256xf32>
    %cst_9 = arith.constant dense<0.000000e+00> : vector<256xf32>
    %30 = vector.multi_reduction <add>, %29, %cst_9 [0] : vector<6x256xf32> to vector<256xf32>
    %31 = vector.shape_cast %30 : vector<256xf32> to vector<1x256xf32>
    %cst_10 = arith.constant dense<0.000000e+00> : vector<256xf32>
    %32 = vector.multi_reduction <add>, %19, %cst_10 [0] : vector<6x256xf32> to vector<256xf32>
    %33 = vector.shape_cast %32 : vector<256xf32> to vector<1x256xf32>
    %34 = arith.mulf %8, %28 : vector<1x256xf32>
    %35 = arith.subf %34, %31 : vector<1x256xf32>
    %36 = vector.shape_cast %35 : vector<1x256xf32> to vector<1x1x256xf32>
    %cst_11 = arith.constant dense<0.000000e+00> : vector<1xf32>
    %37 = vector.multi_reduction <add>, %36, %cst_11 [1, 2] : vector<1x1x256xf32> to vector<1xf32>
    %38 = vector.shape_cast %37 : vector<1xf32> to vector<1x1x1xf32>
    %39 = vector.extract %38[0, 0, 0] : f32 from vector<1x1x1xf32>
    %cst_12 = arith.constant 6.000000e+00 : f32
    %40 = vector.broadcast %cst_12 : f32 to vector<1x256xf32>
    %41 = arith.mulf %40, %28 : vector<1x256xf32>
    %42 = arith.subf %41, %33 : vector<1x256xf32>
    %43 = arith.mulf %8, %42 : vector<1x256xf32>
    %44 = vector.shape_cast %43 : vector<1x256xf32> to vector<1x1x256xf32>
    %cst_13 = arith.constant dense<0.000000e+00> : vector<1xf32>
    %45 = vector.multi_reduction <add>, %44, %cst_13 [1, 2] : vector<1x1x256xf32> to vector<1xf32>
    %46 = vector.shape_cast %45 : vector<1xf32> to vector<1x1x1xf32>
    %47 = vector.extract %46[0, 0, 0] : f32 from vector<1x1x1xf32>
    %48 = tpu.reciprocal %26 : vector<1x256xf32> -> vector<1x256xf32>
    %49 = vector.broadcast %48 : vector<1x256xf32> to vector<6x256xf32>
    %50 = arith.mulf %24, %49 : vector<6x256xf32>
    %51 = arith.mulf %50, %17 : vector<6x256xf32>
    %cst_14 = arith.constant dense<0.000000e+00> : vector<6xf32>
    %52 = vector.multi_reduction <add>, %51, %cst_14 [1] : vector<6x256xf32> to vector<6xf32>
    %53 = vector.shape_cast %52 : vector<6xf32> to vector<6x1xf32>
    %54 = vector.broadcast %8 : vector<1x256xf32> to vector<6x256xf32>
    %55 = arith.mulf %50, %54 : vector<6x256xf32>
    %cst_15 = arith.constant dense<0.000000e+00> : vector<6xf32>
    %56 = vector.multi_reduction <add>, %55, %cst_15 [1] : vector<6x256xf32> to vector<6xf32>
    %57 = vector.shape_cast %56 : vector<6xf32> to vector<6x1xf32>
    %cst_16 = arith.constant dense<0.000000e+00> : vector<6xf32>
    %58 = vector.multi_reduction <add>, %17, %cst_16 [1] : vector<6x256xf32> to vector<6xf32>
    %59 = vector.shape_cast %58 : vector<6xf32> to vector<6x1xf32>
    %60 = tpu.iota {dimensions = array<i32: 1>} : vector<6x128xi32>
    %c0_i32_17 = arith.constant 0 : i32
    %61 = vector.broadcast %c0_i32_17 : i32 to vector<6x128xi32>
    %62 = arith.cmpi eq, %60, %61 : vector<6x128xi32>
    %cst_18 = arith.constant 0.000000e+00 : f32
    %63 = vector.shape_cast %53 : vector<6x1xf32> to vector<6x1xf32>
    %64 = vector.broadcast %63 : vector<6x1xf32> to vector<6x128xf32>
    %65 = vector.broadcast %cst_18 : f32 to vector<6x128xf32>
    %66 = arith.select %62, %64, %65 : vector<6x128xi1>, vector<6x128xf32>
    %c1_i32 = arith.constant 1 : i32
    %67 = vector.broadcast %c1_i32 : i32 to vector<6x128xi32>
    %68 = arith.cmpi eq, %60, %67 : vector<6x128xi32>
    %cst_19 = arith.constant 0.000000e+00 : f32
    %69 = vector.shape_cast %57 : vector<6x1xf32> to vector<6x1xf32>
    %70 = vector.broadcast %69 : vector<6x1xf32> to vector<6x128xf32>
    %71 = vector.broadcast %cst_19 : f32 to vector<6x128xf32>
    %72 = arith.select %68, %70, %71 : vector<6x128xi1>, vector<6x128xf32>
    %73 = arith.addf %66, %72 : vector<6x128xf32>
    %c2_i32 = arith.constant 2 : i32
    %74 = vector.broadcast %c2_i32 : i32 to vector<6x128xi32>
    %75 = arith.cmpi eq, %60, %74 : vector<6x128xi32>
    %cst_20 = arith.constant 0.000000e+00 : f32
    %76 = vector.shape_cast %59 : vector<6x1xf32> to vector<6x1xf32>
    %77 = vector.broadcast %76 : vector<6x1xf32> to vector<6x128xf32>
    %78 = vector.broadcast %cst_20 : f32 to vector<6x128xf32>
    %79 = arith.select %75, %77, %78 : vector<6x128xi1>, vector<6x128xf32>
    %80 = arith.addf %73, %79 : vector<6x128xf32>
    %c0_21 = arith.constant 0 : index
    %c0_22 = arith.constant 0 : index
    %c0_23 = arith.constant 0 : index
    %81 = vector.load %arg5[%c0_21, %c0_22, %c0_23] : memref<1x6x128xf32, #tpu.memory_space<vmem>>, vector<1x6x128xf32>
    %82 = vector.shape_cast %81 : vector<1x6x128xf32> to vector<6x128xf32>
    %83 = arith.addf %82, %80 : vector<6x128xf32>
    %c0_24 = arith.constant 0 : index
    %c0_25 = arith.constant 0 : index
    %c0_26 = arith.constant 0 : index
    %84 = vector.load %arg5[%c0_24, %c0_25, %c0_26] : memref<1x6x128xf32, #tpu.memory_space<vmem>>, vector<1x6x128xf32>
    %85 = vector.shape_cast %84 : vector<1x6x128xf32> to vector<6x128xf32>
    %86 = vector.shape_cast %83 : vector<6x128xf32> to vector<1x6x128xf32>
    tpu.vector_store %arg5[%c0_24, %c0_25, %c0_26], %86 {strides = array<i32>} : memref<1x6x128xf32, #tpu.memory_space<vmem>>, vector<1x6x128xf32>,
    %87 = tpu.iota {dimensions = array<i32: 0>} : vector<8x128xi32>
    %88 = tpu.iota {dimensions = array<i32: 1>} : vector<8x128xi32>
    %cst_27 = arith.constant 0.000000e+00 : f32
    %89 = vector.broadcast %cst_27 : f32 to vector<8x128xf32>
    %c0_i32_28 = arith.constant 0 : i32
    %90 = vector.broadcast %c0_i32_28 : i32 to vector<8x128xi32>
    %91 = arith.cmpi eq, %87, %90 : vector<8x128xi32>
    %c0_i32_29 = arith.constant 0 : i32
    %92 = vector.broadcast %c0_i32_29 : i32 to vector<8x128xi32>
    %93 = arith.cmpi eq, %88, %92 : vector<8x128xi32>
    %94 = arith.andi %91, %93 : vector<8x128xi1>
    %cst_30 = arith.constant 0.000000e+00 : f32
    %95 = vector.broadcast %39 : f32 to vector<8x128xf32>
    %96 = vector.broadcast %cst_30 : f32 to vector<8x128xf32>
    %97 = arith.select %94, %95, %96 : vector<8x128xi1>, vector<8x128xf32>
    %98 = arith.addf %89, %97 : vector<8x128xf32>
    %c0_i32_31 = arith.constant 0 : i32
    %99 = vector.broadcast %c0_i32_31 : i32 to vector<8x128xi32>
    %100 = arith.cmpi eq, %87, %99 : vector<8x128xi32>
    %c1_i32_32 = arith.constant 1 : i32
    %101 = vector.broadcast %c1_i32_32 : i32 to vector<8x128xi32>
    %102 = arith.cmpi eq, %88, %101 : vector<8x128xi32>
    %103 = arith.andi %100, %102 : vector<8x128xi1>
    %cst_33 = arith.constant 0.000000e+00 : f32
    %104 = vector.broadcast %47 : f32 to vector<8x128xf32>
    %105 = vector.broadcast %cst_33 : f32 to vector<8x128xf32>
    %106 = arith.select %103, %104, %105 : vector<8x128xi1>, vector<8x128xf32>
    %107 = arith.addf %98, %106 : vector<8x128xf32>
    %c0_34 = arith.constant 0 : index
    %c0_35 = arith.constant 0 : index
    %c0_36 = arith.constant 0 : index
    %108 = vector.load %arg6[%c0_34, %c0_35, %c0_36] : memref<1x8x128xf32, #tpu.memory_space<vmem>>, vector<1x8x128xf32>
    %109 = vector.shape_cast %108 : vector<1x8x128xf32> to vector<8x128xf32>
    %110 = arith.addf %109, %107 : vector<8x128xf32>
    %c0_37 = arith.constant 0 : index
    %c0_38 = arith.constant 0 : index
    %c0_39 = arith.constant 0 : index
    %111 = vector.load %arg6[%c0_37, %c0_38, %c0_39] : memref<1x8x128xf32, #tpu.memory_space<vmem>>, vector<1x8x128xf32>
    %112 = vector.shape_cast %111 : vector<1x8x128xf32> to vector<8x128xf32>
    %113 = vector.shape_cast %110 : vector<8x128xf32> to vector<1x8x128xf32>
    tpu.vector_store %arg6[%c0_37, %c0_38, %c0_39], %113 {strides = array<i32>} : memref<1x8x128xf32, #tpu.memory_space<vmem>>, vector<1x8x128xf32>,
    return
  }
  func.func @transform_0(%arg0: i32, %arg1: i32, %arg2: i32) -> (i32, i32, i32) {
    %c1_i32 = arith.constant 1 : i32
    %0 = arith.muli %arg1, %c1_i32 : i32
    %1 = arith.addi %0, %arg2 : i32
    %c0_i32 = arith.constant 0 : i32
    %c0_i32_0 = arith.constant 0 : i32
    return %arg0, %c0_i32, %1 : i32, i32, i32
  }
  func.func @transform_1(%arg0: i32, %arg1: i32, %arg2: i32) -> (i32, i32, i32) {
    %c1_i32 = arith.constant 1 : i32
    %0 = arith.muli %arg1, %c1_i32 : i32
    %1 = arith.addi %0, %arg2 : i32
    %c0_i32 = arith.constant 0 : i32
    %c0_i32_0 = arith.constant 0 : i32
    return %arg0, %c0_i32, %1 : i32, i32, i32
  }
  func.func @transform_2(%arg0: i32, %arg1: i32, %arg2: i32) -> (i32, i32, i32) {
    %c1_i32 = arith.constant 1 : i32
    %0 = arith.muli %arg0, %c1_i32 : i32
    %1 = arith.addi %0, %arg1 : i32
    %c0_i32 = arith.constant 0 : i32
    %c0_i32_0 = arith.constant 0 : i32
    %c0_i32_1 = arith.constant 0 : i32
    return %1, %c0_i32, %c0_i32_0 : i32, i32, i32
  }
  func.func @transform_3(%arg0: i32, %arg1: i32, %arg2: i32) -> (i32, i32, i32) {
    %c1_i32 = arith.constant 1 : i32
    %0 = arith.muli %arg0, %c1_i32 : i32
    %1 = arith.addi %0, %arg1 : i32
    %c0_i32 = arith.constant 0 : i32
    %c0_i32_0 = arith.constant 0 : i32
    %c0_i32_1 = arith.constant 0 : i32
    return %1, %c0_i32, %c0_i32_0 : i32, i32, i32
  }
}

</mosaic_0001>

<bundles_post_ra>
// kernel: tpu_custom_call.1
= control target key start
LH: loop header
LB: loop body
LE: loop exit
PB: predicated region body
PF: predicated region fallthrough
CT: control target
= control target key end

     0   :  { %9 = vsyncpa [#allocation3], 0  ;;  %s1065_s0 = inlined_call_operand.vmem [shape: s32[2,1,256], index: 0, kind: input, shape index: {}]   ;;  %s1066_s1 = inlined_call_operand.vmem [shape: f32[2,6,256], index: 1, kind: input, shape index: {}]   ;;  %s1067_s2 = inlined_call_operand.vmem [shape: f32[2,6,128], index: 2, kind: output, shape index: {0}]   ;;  %s1068_s3 = inlined_call_operand.hbm [shape: f32[2,8,128], index: 3, kind: output, shape index: {1}]  }
   0x1   :  { %11 = vsyncpa [#allocation3 + $0x1], 0  ;;  %s868_s12 = smov 0   ;;  %s870_s13 = smov 0  }
   0x2   :  { %s872_s14 = smov 0   ;;  %s874_s15 = smov 0  }
   0x3   :  { %s876_s16 = smov 0   ;;  %s878_s17 = smov 0  }
   0x4 LB: > { %s676_s18 = sadd.s32 4294967295, %s843_s17   ;;  %s677_s19 = sadd.s32 4294967294, %s843_s17   ;;  %s843_s17 = sphi %s878_s17, %s17_s17   ;;  %s839_s16 = sphi %s876_s16, %s1075_s16   ;;  %s835_s15 = sphi %s874_s15, %s1074_s15   ;;  %s831_s14 = sphi %s872_s14, %s1073_s14   ;;  %s827_s13 = sphi %s870_s13, %s1072_s13   ;;  %s823_s12 = sphi %s868_s12, %s1071_s12  }
   0x5   : > { %s36_s20 = sadd.s32 1, %s839_s16  ;;  %s133_s21 = sadd.s32 1, %s831_s14 }
   0x6   : > { %p38_p0 = scmp.ge.s32.totalorder %s36_s20, 2  ;;  %p143_p1 = scmp.ne.s32.totalorder %s831_s14, %s827_s13 }
   0x7   : > { %p144_p2 = scmp.eq.s32.totalorder %s676_s18, 1  ;;  %p149_p3 = scmp.ne.s32.totalorder %s827_s13, %s823_s12 }
   0x8   : > { %s1077_s20 = smov (%p38_p0, %s36_s20), 0  ;;  %p150_p5 = scmp.eq.s32.totalorder %s677_s19, 1 }
   0x9   : > { %p908_p4 = por %p144_p2, %p143_p1  ;;  %s130_s23 = ssub.s32 %s839_s16, %s1077_s20 }
   0xa   : > { %p680_p6 = scmp.ge.s32.totalorder %s843_s17, 1  ;;  %p131_p7 = scmp.eq.s32.totalorder %s130_s23, 0 }
   0xb   : > { %p915_p8 = por %p150_p5, %p149_p3  ;;  %p197_p9 = scmp.lt.s32.totalorder %s843_s17, 3 }
   0xc   : > { %s921_s25 = scalar_select %p131_p7, %s831_s14, %s133_s21  }
   0xd   : > { %p198_p10 = pnand %p680_p6, %p197_p9 }
   0xe   : > { %p242_p11 = scmp.lt.s32.totalorder (!%p198_p10), %s835_s15, 1  ;;  %vm308_vm0 = vcmask (!%p198_p10), 1045504   ;;  %v281_v0 = vlaneseq (!%p198_p10)  ;;  %v845_v20 = vmov (!%p198_p10), 0.0   ;;  %vm428_vm4 = vcmask (!%p198_p10), 1040384   ;;  %s237_s18 = sand.u32 (!%p198_p10), 1, %s827_s13  }
   0xf   : > { %201 = sbr.rel (%p198_p10) target bundleno = 325 (0x145), region = 28  ;;  %s681_s21 = sshll.u32 (!%p198_p10), %s237_s18, 3 }
  0x10   : > { %v938_v8 = vshrl.u32 (!%p198_p10), %v281_v0, 7  ;;  %s541_s5 = scalar_lea.sflag (!%p198_p10), [#allocation3], %s237_s18 }
  0x12   : > { %v941_v13 = vsub.s32 (!%p198_p10), 0, %v938_v8  ;;  %v944_v14 = vsub.s32 (!%p198_p10), 1, %v938_v8  ;;  %vm523_vm8 = vcmp.eq.s32.totalorder (!%p198_p10), %v938_v8, 0 }
  0x16   : > { %s925_s26 = scalar_select %p242_p11, %s835_s15, 1 }
  0x18   : > { %s682_s27 = sshll.u32 %s925_s26, 1  ;;  %s691_s28 = sshll.u32 %s925_s26, 4 }
  0x19   : > { %s260_s4 = scalar_lea.vmem %s1066_s1, %s691_s28  ;;  %s248_s7 = scalar_lea.vmem %s1065_s0, %s682_s27 }
  0x1a   : > { %v306_v1 = vld [vmem:[%s260_s4] sm:$0x3f]  ;;  %v307_v2 = vld [vmem:[%s260_s4 + $0x8] sm:$0x3f]  ;;  %s685_s8 = sshll.u32 %s925_s26, 3  ;;  %s688_s26 = sshll.u32 %s835_s15, 7 }
  0x1b   : > { %v309_v3 = vsel %vm308_vm0, %v306_v1, -inf  ;;  %v316_v4 = vsel %vm308_vm0, %v307_v2, -inf  ;;  %v276_v7 = vld [vmem:[%s248_s7] sm:$0x3]  ;;  %v365_v47 = vsel %vm308_vm0, %v306_v1, 0.0  ;;  %v372_v51 = vsel %vm308_vm0, %v307_v2, 0.0  ;;  %s267_s11 = scalar_lea.vmem %s1067_s2, %s685_s8  ;;  %s1018_s4 = scalar_lea.hbm %s1068_s3, %s688_s26 }
  0x1c   : > { %v310_v5 = vrot.slane %v309_v3, 4  ;;  %v317_v6 = vrot.slane %v316_v4, 4  ;;  %vm277_vm1 = vcmp.ne.s32.totalorder %v276_v7, 255  ;;  %v366_v54 = vrot.slane %v365_v47, 4  ;;  %274 = vst [vmem:[%s267_s11] sm:$0x3f] %v845_v20  ;;  %s239_s27 = scalar_lea.vmem [#allocation2], %s681_s21 }
  0x1d   : > { %v280_v17 = vsel %vm277_vm1, %v276_v7, 0  ;;  %v947_v21 = vsel %vm277_vm1, 1.0, %v845_v20  ;;  %v373_v56 = vrot.slane %v372_v51, 4  ;;  %s559_s28 = sshll.u32 %s239_s27, 4  ;;  %s847_s15 = smov [#allocation2]   ;;  %s1020_s28 = int_to_ptr.vmem [resolvable:$true] %s559_s28 }
  0x1e   : > { %v311_v9 = vmax.f32 %v309_v3, %v310_v5  ;;  %v318_v10 = vmax.f32 %v316_v4, %v317_v6  ;;  %v286_v22 = vrot.slane %v280_v17, %v941_v13  ;;  %v290_v23 = vrot.slane %v280_v17, %v944_v14  ;;  %s765_s6 = scalar_lea.vmem %s1020_s28, 128  ;;  %s769_s7 = sshll.u32 %s847_s15, 4  ;;  %s770_s7 = int_to_ptr.vmem [resolvable:$false] %s769_s7 }
  0x1f   : > { %v959_v28 = vrot.slane %v947_v21, %v941_v13  ;;  %v963_v29 = vrot.slane %v947_v21, %v944_v14  ;;  %v367_v62 = vadd.f32 %v366_v54, %v365_v47  ;;  %v374_v3 = vadd.f32 %v373_v56, %v372_v51  ;;  %p766_p12 = scmp.ne.s32.totalorder %s1020_s28, %s765_s6  ;;  %s771_s8 = scalar_lea.vmem %s770_s7, 256 }
  0x20   : > { %v312_v11 = vrot.slane %v311_v9, 2  ;;  %v319_v12 = vrot.slane %v318_v10, 2  ;;  %vm291_vm2 = vcmp.eq.s32.totalorder %v938_v8, %v286_v22  ;;  %vm292_vm3 = vcmp.eq.s32.totalorder %v938_v8, %v290_v23  ;;  %p772_p1 = scmp.lt.s32.totalorder %s1020_s28, %s770_s7  ;;  %p773_p2 = scmp.lt.s32.totalorder %s771_s8, %s765_s6 }
  0x21   : > { %v968_v32 = vsel %vm291_vm2, %v959_v28, 0.0  ;;  %v971_v33 = vsel %vm292_vm3, %v963_v29, 0.0  ;;  %v368_v6 = vrot.slane %v367_v62, 2  ;;  %p767_p13 = pnand %p766_p12, %p908_p4 }
  0x22   : > { %v313_v15 = vmax.f32 %v311_v9, %v312_v11  ;;  %v320_v16 = vmax.f32 %v318_v10, %v319_v12  ;;  %v349_v34 = vmul.f32 %v306_v1, %v968_v32  ;;  %v350_v35 = vmul.f32 %v307_v2, %v971_v33  ;;  %p774_p3 = por %p773_p2, %p772_p1 }
  0x23   : > { %v846_v10 = vmov 1966171168   ;;  %v369_v12 = vadd.f32 %v368_v6, %v367_v62  ;;  %p768_p0 = pneg %p767_p13 }
  0x24   : > { %v314_v18 = vrot.slane %v313_v15, 1  ;;  %v321_v19 = vrot.slane %v320_v16, 1  ;;  %v351_v36 = vsel %vm308_vm0, %v349_v34, 0.0  ;;  %v358_v37 = vsel %vm308_vm0, %v350_v35, 0.0 }
  0x25   : > { %v352_v41 = vrot.slane %v351_v36, 4  ;;  %v359_v42 = vrot.slane %v358_v37, 4  ;;  %v383_v11 = vunpack.c.l.s4 %v846_v10  ;;  %p775_p5 = pnand %p774_p3, %p768_p0 }
  0x26   : > { %v951_v24 = vmax.f32 %v313_v15, %v314_v18  ;;  %v953_v25 = vmax.f32 %v320_v16, %v321_v19  ;;  %v370_v19 = vrot.slane %v369_v12, 1 }
  0x27   : > { %v353_v49 = vadd.f32 %v352_v41, %v351_v36  ;;  %v360_v50 = vadd.f32 %v359_v42, %v358_v37  ;;  %v384_v18 = vunpack.c.0.s8 %v383_v11 }
  0x28   : > { %v323_v26 = vsub.f32 %v306_v1, %v951_v24  ;;  %v324_v27 = vsub.f32 %v307_v2, %v953_v25  ;;  %v375_v2 = vrot.slane %v374_v3, 2 }
  0x29   : > { %v354_v58 = vrot.slane %v353_v49, 2  ;;  %v361_v59 = vrot.slane %v360_v50, 2  ;;  %v387_v37 = vsub.s32 %v384_v18, %v938_v8 }
  0x2a   : > { %v325_v30 = vmul.f32 1.442695, %v323_v26  ;;  %v327_v31 = vmul.f32 1.442695, %v324_v27  ;;  %v376_v15 = vadd.f32 %v375_v2, %v374_v3 }
  0x2b   : > { %v355_v1 = vadd.f32 %v354_v58, %v353_v49  ;;  %v362_v5 = vadd.f32 %v361_v59, %v360_v50 }
  0x2c   : > { %753 = vpow2.f32 %v325_v30  ;;  %v377_v23 = vrot.slane %v376_v15, 1 }
  0x2d   : > { %755 = vpow2.f32 %v327_v31  ;;  %v356_v7 = vrot.slane %v355_v1, 1  ;;  %v363_v9 = vrot.slane %v362_v5, 1 }
  0x2f   : > { %v357_v16 = vadd.f32 %v356_v7, %v355_v1  ;;  %v364_v17 = vadd.f32 %v363_v9, %v362_v5 }
  0x31   : > { %v400_v30 = vcombine.low %v357_v16, %v364_v17 }
  0x36   : > { %v754_v38 = vpop.eup %753 }
  0x37   : > { %v756_v39 = vpop.eup %755  ;;  %v329_v40 = vsel %vm308_vm0, %v754_v38, 0.0 }
  0x38   : > { %v330_v43 = vrot.slane %v329_v40, 4  ;;  %v336_v44 = vsel %vm308_vm0, %v756_v39, 0.0 }
  0x39   : > { %v337_v45 = vrot.slane %v336_v44, 4 }
  0x3a   : > { %v331_v46 = vadd.f32 %v330_v43, %v329_v40  ;;  %v371_v40 = vadd.f32 %v370_v19, %v369_v12  ;;  %v378_v43 = vadd.f32 %v377_v23, %v376_v15  ;;  %v505_v12 = vsel %vm308_vm0, %v968_v32, 0.0 }
  0x3b   : > { %v338_v48 = vadd.f32 %v337_v45, %v336_v44  ;;  %v407_v45 = vrot.slane %v400_v30, %v387_v37  ;;  %v506_v15 = vsel %vm308_vm0, %v971_v33, 0.0 }
  0x3c   : > { %v332_v52 = vrot.slane %v331_v46, 2  ;;  %v507_v16 = vadd.f32 %v506_v15, %v505_v12 }
  0x3d   : > { %v339_v53 = vrot.slane %v338_v48, 2 }
  0x3e   : > { %v333_v55 = vadd.f32 %v332_v52, %v331_v46 }
  0x3f   : > { %v340_v57 = vadd.f32 %v339_v53, %v338_v48 }
  0x40   : > { %v334_v60 = vrot.slane %v333_v55, 1 }
  0x41   : > { %v341_v61 = vrot.slane %v340_v57, 1 }
  0x42   : > { %v335_v63 = vadd.f32 %v334_v60, %v333_v55 }
  0x43   : > { %v342_v4 = vadd.f32 %v341_v61, %v340_v57 }
  0x44   : > { %757 = vlog2.f32 %v335_v63 }
  0x45   : > { %759 = vlog2.f32 %v342_v4 }
  0x46   : > { %761 = vrcp.f32 %v335_v63 }
  0x47   : > { %763 = vrcp.f32 %v342_v4 }
  0x4e   : > { %v758_v22 = vpop.eup %757 }
  0x4f   : > { %v760_v26 = vpop.eup %759  ;;  %v344_v27 = vmul.f32 0.6931472, %v758_v22 }
  0x50   : > { %v762_v31 = vpop.eup %761  ;;  %v346_v34 = vmul.f32 0.6931472, %v760_v26 }
  0x51   : > { %v764_v35 = vpop.eup %763  ;;  %v347_v36 = vadd.f32 %v344_v27, %v951_v24  ;;  %v489_v41 = vmul.f32 %v762_v31, %v754_v38 }
  0x52   : > { %v348_v42 = vadd.f32 %v346_v34, %v953_v25  ;;  %v490_v44 = vmul.f32 %v764_v35, %v756_v39  ;;  %v520_v35 = vld [vmem:[%s267_s11] sm:$0x3f] }
  0x53   : > { %v441_v46 = vmul.f32 6.0, %v347_v36  ;;  %v491_v47 = vmul.f32 %v489_v41, %v968_v32  ;;  %v498_v48 = vmul.f32 %v489_v41, %v959_v28  ;;  %v414_v28 = vrot.slane %v407_v45, %v387_v37 }
  0x54   : > { %v381_v49 = vcombine.low %v347_v36, %v348_v42  ;;  %v442_v50 = vmul.f32 6.0, %v348_v42  ;;  %v492_v51 = vmul.f32 %v490_v44, %v971_v33  ;;  %v499_v24 = vmul.f32 %v490_v44, %v963_v29 }
  0x55   : > { %v443_v52 = vsub.f32 %v441_v46, %v371_v40  ;;  %v493_v53 = vsel %vm308_vm0, %v491_v47, 0.0  ;;  %v500_v38 = vsel %vm308_vm0, %v498_v48, 0.0 }
  0x56   : > { %v388_v25 = vrot.slane %v381_v49, %v387_v37  ;;  %v444_v54 = vsub.f32 %v442_v50, %v378_v43  ;;  %v494_v39 = vsel %vm308_vm0, %v492_v51, 0.0  ;;  %v501_v55 = vsel %vm308_vm0, %v499_v24, 0.0 }
  0x57   : > { %v495_v56 = vadd.f32 %v494_v39, %v493_v53  ;;  %v502_v59 = vadd.f32 %v501_v55, %v500_v38 }
  0x58   : > { %v395_v57 = vrot.slane %v388_v25, %v387_v37  ;;  %v447_v58 = vcombine.low %v443_v52, %v444_v54 }
  0x59   : > { %496 = vadd.xlane.f32.xlu1 %v495_v56 }
  0x5a   : > { %v397_v60 = vmul.f32 %v947_v21, %v395_v57  ;;  %v454_v29 = vrot.slane %v447_v58, %v387_v37 }
  0x5c   : > { %v416_v61 = vsub.f32 %v397_v60, %v414_v28  ;;  %v461_v62 = vrot.slane %v454_v29, %v387_v37 }
  0x5d   : > { %503 = vadd.xlane.f32.xlu1 %v502_v59 }
  0x5e   : > { %v421_v63 = vrot.slane %v416_v61, %v941_v13  ;;  %v425_v3 = vrot.slane %v416_v61, %v944_v14  ;;  %v463_v4 = vmul.f32 %v947_v21, %v461_v62 }
  0x60   : > { %v429_v1 = vsel %vm428_vm4, %v421_v63, 0.0  ;;  %v430_v5 = vsel %vm428_vm4, %v425_v3, 0.0  ;;  %v468_v6 = vrot.slane %v463_v4, %v941_v13  ;;  %v472_v2 = vrot.slane %v463_v4, %v944_v14 }
  0x61   : > { %v431_v7 = vadd.f32 %v430_v5, %v429_v1  ;;  %v511_v14 = vand.u32 127, %v281_v0 }
  0x62   : > { %v475_v9 = vsel %vm428_vm4, %v468_v6, 0.0  ;;  %v476_v10 = vsel %vm428_vm4, %v472_v2, 0.0 }
  0x63   : > { %432 = vadd.xlane.f32.xlu0 %v431_v7  ;;  %v477_v11 = vadd.f32 %v476_v10, %v475_v9  ;;  %vm512_vm5 = vcmp.eq.s32.totalorder %v511_v14, 0  ;;  %vm514_vm6 = vcmp.eq.s32.totalorder %v511_v14, 1  ;;  %vm517_vm7 = vcmp.eq.s32.totalorder %v511_v14, 2 }
  0x64   : > { %vm524_vm9 = vmand %vm523_vm8, %vm512_vm5 }
  0x65   : > { %vm528_vm10 = vmand %vm523_vm8, %vm514_vm6 }
  0x67   : > { %478 = vadd.xlane.f32.xlu0 %v477_v11 }
  0x6b   : > { %508 = vadd.xlane.f32.xlu0 %v507_v16 }
  0xe6   : > { %v497_v13 = vpop.xlane.xlu1 %496 }
  0xe7   : > { %v513_v33 = vsel %vm512_vm5, %v497_v13, 0.0 }
  0xea   : > { %v504_v32 = vpop.xlane.xlu1 %503 }
  0xeb   : > { %v515_v19 = vsel %vm514_vm6, %v504_v32, 0.0 }
  0xec   : > { %v516_v27 = vadd.f32 %v515_v19, %v513_v33 }
  0xf0   : > { %v433_v21 = vpop.xlane.xlu0 %432 }
  0xf1   : > { %v434_v17 = vrot.slane %v433_v21, 4 }
  0xf3   : > { %v435_v18 = vadd.f32 %v434_v17, %v433_v21 }
  0xf4   : > { %v479_v22 = vpop.xlane.xlu0 %478 }
  0xf5   : > { %v436_v23 = vrot.slane %v435_v18, 2  ;;  %v480_v26 = vrot.slane %v479_v22, 4 }
  0xf7   : > { %v481_v30 = vadd.f32 %v480_v26, %v479_v22  ;;  %v437_v20 = vadd.f32 %v436_v23, %v435_v18 }
  0xf8   : > { %v509_v31 = vpop.xlane.xlu0 %508 }
  0xf9   : > { %v482_v0 = vrot.slane %v481_v30, 2  ;;  %v438_v34 = vrot.slane %v437_v20, 1  ;;  %v518_v36 = vsel %vm517_vm7, %v509_v31, 0.0 }
  0xfa   : > { %v519_v37 = vadd.f32 %v518_v36, %v516_v27 }
  0xfb   : > { %v439_v40 = vadd.f32 %v438_v34, %v437_v20  ;;  %v483_v41 = vadd.f32 %v482_v0, %v481_v30 }
  0xfc   : > { %v521_v42 = vadd.f32 %v520_v35, %v519_v37 }
  0xfd   : > { %692 = vpush %v439_v40  ;;  %v484_v43 = vrot.slane %v483_v41, 1 }
  0xfe   : > { %522 = vst [vmem:[%s267_s11] sm:$0x3f] %v521_v42 }
  0xff   : > { %v485_v44 = vadd.f32 %v484_v43, %v483_v41 }
 0x101   : > { %694 = vpush %v485_v44 }
 0x12e   : > { %s693_s19 = spop %692 }
 0x12f   : > { %v525_v45 = vstv %s693_s19 }
 0x130   : > { %v526_v47 = vsel %vm524_vm9, %v525_v45, 0.0 }
 0x132   : > { %s695_s23 = spop %694 }
 0x133   : > { %v529_v46 = vstv %s695_s23 }
 0x134   : > { %v530_v48 = vsel %vm528_vm10, %v529_v46, 0.0 }
 0x135   : > { %v531_v49 = vadd.f32 %v530_v48, %v526_v47 }
 0x137   : > { %534 = vst [vmem:[%s239_s27] sm:$0xff] %v531_v49 }
 0x138   : > { %778 = shalt.err (!%p775_p5)
}
 0x139   : > { %s779_s9 = scalar_lea.hbm %s1018_s4, 128  ;;  %s783_s18 = scalar_lea.hbm %s1068_s3, 256 }
 0x13a   : > { %p780_p6 = scmp.ne.s32.totalorder %s1018_s4, %s779_s9  ;;  %p784_p10 = scmp.lt.u32.totalorder %s1018_s4, %s1068_s3 }
 0x13b   : > { %p785_p11 = scmp.lt.u32.totalorder %s783_s18, %s779_s9  ;;  %p787_p13 = scmp.lt.u32.totalorder %s779_s9, %s1018_s4 }
 0x13c   : > { %p781_p7 = pnand %p780_p6, %p908_p4 }
 0x13d   : > { %p786_p12 = por %p785_p11, %p784_p10 }
 0x13e   : > { %p782_p9 = pneg %p781_p7 }
 0x13f   : > { %p788_p0 = por %p787_p13, %p786_p12 }
 0x141   : > { %p789_p1 = pnand %p788_p0, %p782_p9 }
 0x143   : > { %792 = shalt.err (!%p789_p1)
}
 0x144   : > { %696 = dma.vmem_to_hbm [thread:$0]  (%p908_p4), %s1020_s28, 128, %s1018_s4, %s541_s5  }
 0x145 PF: > { %p702_p2 = scmp.ge.s32.totalorder %s843_s17, 2  ;;  %s579_s23 = sand.u32 1, %s823_s12  }
 0x146   : > { %s580_s26 = scalar_lea.sflag [#allocation3], %s579_s23 }
 0x147   : > { %p699_p3 = pnand %p702_p2, %p915_p8 }
 0x149   : > { %818 = dma.done.wait (!%p699_p3), %s580_s26, 128  }
 0x14a   : > { %820 = vsyncadd (!%p699_p3), %s580_s26, 4294967168  ;;  %s17_s17 = sadd.s32 1, %s843_s17   ;;  %s1071_s12 = smov %s827_s13 }
 0x14b   : > { %p14_p5 = scmp.ge.s32.totalorder %s17_s17, 4   ;;  %s1072_s13 = smov %s831_s14 }
 0x14c   : > { %s1073_s14 = smov %s921_s25  ;;  %s1074_s15 = smov %s839_s16 }
 0x14d   : > { %s1075_s16 = smov %s1077_s20  ;;  %16 = sbr.rel (!%p14_p5) target bundleno = 4 (0x4), region = 82 }
 0x154   :  { %585 = vsyncpa [#allocation3], 1 }
 0x155   :  { %587 = vsyncpa [#allocation3 + $0x1], 1 }

</bundles_post_ra>
